<compile_context>
chip_gen: v7x
topology: tpu7x:2x2x1
jax: 0.10.0
libtpu: 0.0.40
codegen_flags: <defaults>
</compile_context>

<pallas_src>
import jax
import jax.numpy as jnp
import numpy as np
from jax.experimental import pallas as pl
from jax.experimental.pallas import tpu as pltpu

# ----------------------------- model hyper-params ---------------------------
B = 2              # batch
IN_STEPS = 8       # args.emb['input_len']
N = 16             # num_nodes
F = 3              # args.emb['input_dim'] (signal + tid + diw)
NUM_FEAT = 1       # args.emb['num_feat']
C_IN = IN_STEPS * F              # 24 -> in_channels of emb_layer_history
E = 32                           # args.emb['adaptive_emb_dim']
NODE_DIM = 16                    # args.emb['D^N']
TCN_OUT = 16                     # args.tcn['out_channel']
K = 3                            # args.tcn['kernel_size']
DIL = 1                          # args.tcn['dilation']
PAD = int((K - 1) * DIL / 2)     # 'same' padding = 1
HID = E + NODE_DIM + TCN_OUT     # 64 (is_TMRB = False)
NUM_LAYER = 2                    # args.emb['num_layer']
OUT_LEN = 12                     # args.emb['output_len']

BN = B * N                       # 32 rows -> single no-grid invocation
OUT_PAD = 128                    # lane-dense output width (sliced outside)

SIDE_OFFS = tuple(j * DIL - PAD for j in range(K) if j * DIL - PAD != 0)   # (-1, +1)
assert SIDE_OFFS == (-1, 1) and NUM_LAYER == 2

# packed-slab row layout (sub-blocks padded to WPAD = 72 cols; 8-aligned rows)
WPAD = HID + 8                   # 72 : hidden + ones lane + 7 pad lanes
R_S1 = 0                         # (72,72) stacked tap weights  [x | x<<1 | x>>1]
R_B1 = R_S1 + WPAD               # 72 : (32,72) stage-1 per-row bias image (ones lane @ col HID)
R_S2 = R_B1 + BN                 # 104: (72,72) enc-0 FC1 (bias in row HID)
R_S3 = R_S2 + WPAD               # 176: (72,72) enc-0 FC2 (bias deferred)
R_S4 = R_S3 + WPAD               # 248: (72,72) enc-1 FC1 (b1_1 + b2_0@W1_1 in row HID)
W_ROWS = R_S4 + WPAD             # 320
P_K = 2 * WPAD                   # 144: K of the fused FC2+residual+projection matmul


# --------------------------------- kernel -----------------------------------
def basic_model_kernel(x_ref, w_ref, p_ref, out_ref):
    f32 = jnp.float32
    x = x_ref[...]                                            # (BN, C_IN)

    # ---- stage 1: emb | node_emb | tcn -- all 3 Conv1d taps in ONE matmul ----
    # roll the small input along the node (sublane) axis for the off-centre
    # taps, edge-mask per batch element, lane-stack into a (BN, 72) LHS.
    node = jax.lax.broadcasted_iota(jnp.int32, (BN, C_IN), 0) & (N - 1)
    x_m = jnp.where(node > 0,     pltpu.roll(x, shift=1,      axis=0), 0.0)  # tap off=-1
    x_p = jnp.where(node < N - 1, pltpu.roll(x, shift=BN - 1, axis=0), 0.0)  # tap off=+1
    lhs = jnp.concatenate([x, x_m, x_p], axis=1)              # (BN, 72)

    # per-row bias image carries every stage-1 bias and a constant-one lane @ col HID
    h = jnp.dot(lhs, w_ref[R_S1:R_S1 + WPAD, :], preferred_element_type=f32) \
        + w_ref[R_B1:R_B1 + BN, :]                            # (BN, 72), lane HID == 1

    # ---- encoder layer 0 (FC1 bias rides the ones lane; FC2 bias deferred) ----
    h1 = jnp.maximum(
        jnp.dot(h, w_ref[R_S2:R_S2 + WPAD, :], preferred_element_type=f32), 0.0)
    h = h + jnp.dot(h1, w_ref[R_S3:R_S3 + WPAD, :], preferred_element_type=f32)

    # ---- encoder layer 1 FC1 (b1_1 + deferred b2_0@W1_1 folded into row HID) ----
    h1 = jnp.maximum(
        jnp.dot(h, w_ref[R_S4:R_S4 + WPAD, :], preferred_element_type=f32), 0.0)

    # ---- fused layer-1 FC2 + residual + projection head: one K=144 matmul ----
    # pslab rows: [Wp | total-bias row (picked by ones lane) | pad | W2_1@Wp | pad]
    out_ref[...] = jnp.dot(jnp.concatenate([h, h1], axis=1), p_ref[...],
                           preferred_element_type=f32)        # (BN, 128) dense store


# ----------------------- host-side one-time parameter packing ----------------
def pack_params(p):
    """Pack all weights into two slabs.  Call ONCE, outside the jitted forward."""
    f32 = jnp.float32
    hi = jax.lax.Precision.HIGHEST
    mm = lambda a, b: jnp.matmul(a, b, precision=hi)

    def pad(a, rows, cols):
        return jnp.pad(a, ((0, rows - a.shape[0]), (0, cols - a.shape[1])))

    w_emb, b_emb = p["w_emb"], p["b_emb"]          # (24,32), (1,32)
    w_tcn, b_tcn = p["w_tcn"], p["b_tcn"]          # (3,32,16), (1,16)
    zeros_en = jnp.zeros((C_IN, E + NODE_DIM), f32)

    # stage-1 weights: centre tap (carries the emb columns) + the two side taps
    s1 = [jnp.concatenate([w_emb, jnp.zeros((C_IN, NODE_DIM), f32),
                           mm(w_emb, w_tcn[PAD])], axis=1)]
    for off in SIDE_OFFS:
        s1.append(jnp.concatenate([zeros_en, mm(w_emb, w_tcn[off + PAD])], axis=1))
    s1 = jnp.concatenate(s1, axis=0)                                     # (72, 64)

    # stage-1 per-row bias image: base biases + edge-masked side biases + ones lane
    base_b = jnp.concatenate(
        [b_emb, p["node_emb"], b_tcn + mm(b_emb, w_tcn[PAD])], axis=1)   # (1, 64)
    bias_img = jnp.broadcast_to(base_b, (BN, HID))
    node = np.arange(BN) % N
    for off in SIDE_OFFS:
        side_b = jnp.concatenate(
            [jnp.zeros((1, E + NODE_DIM), f32), mm(b_emb, w_tcn[off + PAD])], axis=1)
        valid = ((node + off >= 0) & (node + off < N)).astype(np.float32)[:, None]
        bias_img = bias_img + jnp.asarray(valid) * side_b
    bias_img = jnp.concatenate(
        [bias_img, jnp.ones((BN, 1), f32), jnp.zeros((BN, WPAD - HID - 1), f32)],
        axis=1)                                                           # (32, 72)

    w1_0, b1_0 = p["w_fc1"][0], p["b_fc1"][0]
    w2_0, b2_0 = p["w_fc2"][0], p["b_fc2"][0]
    w1_1, b1_1 = p["w_fc1"][1], p["b_fc1"][1]
    w2_1, b2_1 = p["w_fc2"][1], p["b_fc2"][1]
    wp, bp = p["w_proj"], p["b_proj"]

    s2 = jnp.concatenate([w1_0, b1_0], axis=0)                            # (65, 64)
    s3 = w2_0                                                             # (64, 64)
    s4 = jnp.concatenate([w1_1, b1_1 + mm(b2_0, w1_1)], axis=0)           # (65, 64)

    wslab = jnp.concatenate(
        [pad(s1, WPAD, WPAD), bias_img, pad(s2, WPAD, WPAD),
         pad(s3, WPAD, WPAD), pad(s4, WPAD, WPAD)], axis=0)               # (320, 72)
    assert wslab.shape == (W_ROWS, WPAD)

    top = jnp.concatenate([wp, mm(b2_0 + b2_1, wp) + bp], axis=0)         # (65, 12)
    pslab = jnp.concatenate(
        [pad(top, WPAD, OUT_PAD), pad(mm(w2_1, wp), WPAD, OUT_PAD)], axis=0)  # (144, 128)
    assert pslab.shape == (P_K, OUT_PAD)
    return wslab, pslab


# --------------------------------- forward ----------------------------------
@jax.jit
def basic_model_forward(x, wslab, pslab):
    """x: (B, IN_STEPS, N, F) torch-style input.  Returns (B, OUT_LEN, N, 1)."""
    # flatten per node exactly like
    #   x.transpose(1,2).view(B, N, -1).transpose(1,2).unsqueeze(-1),
    # kept channel-last and batch-collapsed: (B*N, T*F)
    x_flat = jnp.transpose(x, (0, 2, 1, 3)).reshape(BN, C_IN)

    out = pl.pallas_call(
        basic_model_kernel,
        out_shape=jax.ShapeDtypeStruct((BN, OUT_PAD), jnp.float32),
        in_specs=[pl.BlockSpec(memory_space=pltpu.MemorySpace.VMEM)] * 3,
        out_specs=pl.BlockSpec(memory_space=pltpu.MemorySpace.VMEM),
    )(x_flat, wslab, pslab)

    out = out[:, :OUT_LEN].reshape(B, N, OUT_LEN)
    return jnp.transpose(out, (0, 2, 1))[..., None]           # (B, OUT_LEN, N, 1)


# ------------------------------ pure-JAX reference --------------------------
def reference_forward(x, p):
    hi = jax.lax.Precision.HIGHEST
    mm = lambda a, b: jnp.matmul(a, b, precision=hi)
    x_flat = jnp.transpose(x, (0, 2, 1, 3)).reshape(B, N, C_IN)
    emb = mm(x_flat, p["w_emb"]) + p["b_emb"]                             # (B,N,E)
    emb_pad = jnp.pad(emb, ((0, 0), (PAD, PAD), (0, 0)))
    tcn = jnp.broadcast_to(p["b_tcn"], (B, N, TCN_OUT))
    for j in range(K):
        tcn = tcn + mm(emb_pad[:, j * DIL:j * DIL + N, :], p["w_tcn"][j])
    node = jnp.broadcast_to(p["node_emb"][None], (B, N, NODE_DIM))
    h = jnp.concatenate([emb, node, tcn], axis=-1)
    for l in range(NUM_LAYER):
        h1 = jnp.maximum(mm(h, p["w_fc1"][l]) + p["b_fc1"][l], 0.0)
        h = h + mm(h1, p["w_fc2"][l]) + p["b_fc2"][l]
    out = mm(h, p["w_proj"]) + p["b_proj"]
    return jnp.transpose(out, (0, 2, 1))[..., None]


# --------------------------------- main --------------------------------------
if __name__ == "__main__":
    key = jax.random.PRNGKey(0)
    ks = jax.random.split(key, 16)

    def uni(k, shape, scale=0.1):
        return jax.random.uniform(k, shape, jnp.float32, -scale, scale)

    params = {
        "w_emb":    uni(ks[0], (C_IN, E)),
        "b_emb":    uni(ks[1], (1, E)),
        "w_tcn":    uni(ks[2], (K, E, TCN_OUT)),
        "b_tcn":    uni(ks[3], (1, TCN_OUT)),
        "node_emb": uni(ks[4], (1, NODE_DIM)),          # nn.Parameter(1, D^N)
        "w_fc1":    uni(ks[5], (NUM_LAYER, HID, HID)),
        "b_fc1":    uni(ks[6], (NUM_LAYER, 1, HID)),
        "w_fc2":    uni(ks[7], (NUM_LAYER, HID, HID)),
        "b_fc2":    uni(ks[8], (NUM_LAYER, 1, HID)),
        "w_proj":   uni(ks[9], (HID, OUT_LEN)),
        "b_proj":   uni(ks[10], (1, OUT_LEN)),
    }

    # deterministic input: feature 0 = signal, 1 = time-in-day frac, 2 = day-in-week
    sig = jax.random.normal(ks[11], (B, IN_STEPS, N, NUM_FEAT), jnp.float32)
    tid = jax.random.uniform(ks[12], (B, IN_STEPS, N, 1), jnp.float32)
    diw = jax.random.randint(ks[13], (B, IN_STEPS, N, 1), 0, 7).astype(jnp.float32)
    x = jnp.concatenate([sig, tid, diw], axis=-1)       # (B, T, N, F)

    # one-time packing (outside the per-call jit), then the kernel call
    wslab, pslab = pack_params(params)
    wslab, pslab = jax.block_until_ready((wslab, pslab))

    out = jax.block_until_ready(basic_model_forward(x, wslab, pslab))
    ref = jax.block_until_ready(reference_forward(x, params))

    assert out.shape == (B, OUT_LEN, N, 1), out.shape
    np.testing.assert_allclose(np.asarray(out), np.asarray(ref),
                               rtol=1e-4, atol=2e-4)
    print("KERNEL_OK")
</pallas_src>

<mosaic_0001>
module attributes {stable_mosaic.version = 11 : i64} {
  func.func @basic_model_kernel(%arg0: memref<32x24xf32, #tpu.memory_space<vmem>>, %arg1: memref<320x72xf32, #tpu.memory_space<vmem>>, %arg2: memref<144x128xf32, #tpu.memory_space<vmem>>, %arg3: memref<32x128xf32, #tpu.memory_space<vmem>>) attributes {dimension_semantics = [], scalar_prefetch = 0 : i64, scratch_operands = 0 : i64, tpu.core_type = #tpu.core_type<tc>} {
    %c0 = arith.constant 0 : index
    %c0_0 = arith.constant 0 : index
    %0 = vector.load %arg0[%c0, %c0_0] : memref<32x24xf32, #tpu.memory_space<vmem>>, vector<32x24xf32>
    %1 = tpu.iota {dimensions = array<i32: 0>} : vector<32x24xi32>
    %c15_i32 = arith.constant 15 : i32
    %2 = vector.broadcast %c15_i32 : i32 to vector<32x24xi32>
    %3 = arith.andi %1, %2 : vector<32x24xi32>
    %c0_i32 = arith.constant 0 : i32
    %4 = vector.broadcast %c0_i32 : i32 to vector<32x24xi32>
    %5 = arith.cmpi sgt, %3, %4 : vector<32x24xi32>
    %c1_i32 = arith.constant 1 : i32
    %6 = tpu.dynamic_rotate %0 by %c1_i32 dim 0 : vector<32x24xf32>, i32 -> vector<32x24xf32>
    %cst = arith.constant 0.000000e+00 : f32
    %7 = vector.broadcast %cst : f32 to vector<32x24xf32>
    %8 = arith.select %5, %6, %7 : vector<32x24xi1>, vector<32x24xf32>
    %c15_i32_1 = arith.constant 15 : i32
    %9 = vector.broadcast %c15_i32_1 : i32 to vector<32x24xi32>
    %10 = arith.cmpi slt, %3, %9 : vector<32x24xi32>
    %c31_i32 = arith.constant 31 : i32
    %11 = tpu.dynamic_rotate %0 by %c31_i32 dim 0 : vector<32x24xf32>, i32 -> vector<32x24xf32>
    %cst_2 = arith.constant 0.000000e+00 : f32
    %12 = vector.broadcast %cst_2 : f32 to vector<32x24xf32>
    %13 = arith.select %10, %11, %12 : vector<32x24xi1>, vector<32x24xf32>
    %14 = tpu.concatenate %0, %8, %13 in 1 : vector<32x24xf32>, vector<32x24xf32>, vector<32x24xf32> -> vector<32x72xf32>
    %c0_3 = arith.constant 0 : index
    %c0_4 = arith.constant 0 : index
    %15 = vector.load %arg1[%c0_3, %c0_4] : memref<320x72xf32, #tpu.memory_space<vmem>>, vector<72x72xf32>
    %cst_5 = arith.constant dense<0.000000e+00> : vector<32x72xf32>
    %16 = tpu.matmul %14, %15, %cst_5 {dimension_numbers = #tpu.dot_dimension_numbers<[1], [0], [0], [1], [0, 0, 1, 1], [], []>} : vector<32x72xf32>, vector<72x72xf32>, vector<32x72xf32> -> vector<32x72xf32>
    %c72 = arith.constant 72 : index
    %c0_6 = arith.constant 0 : index
    %17 = vector.load %arg1[%c72, %c0_6] : memref<320x72xf32, #tpu.memory_space<vmem>>, vector<32x72xf32>
    %18 = arith.addf %16, %17 : vector<32x72xf32>
    %c104 = arith.constant 104 : index
    %c0_7 = arith.constant 0 : index
    %19 = vector.load %arg1[%c104, %c0_7] : memref<320x72xf32, #tpu.memory_space<vmem>>, vector<72x72xf32>
    %cst_8 = arith.constant dense<0.000000e+00> : vector<32x72xf32>
    %20 = tpu.matmul %18, %19, %cst_8 {dimension_numbers = #tpu.dot_dimension_numbers<[1], [0], [0], [1], [0, 0, 1, 1], [], []>} : vector<32x72xf32>, vector<72x72xf32>, vector<32x72xf32> -> vector<32x72xf32>
    %cst_9 = arith.constant 0.000000e+00 : f32
    %21 = vector.broadcast %cst_9 : f32 to vector<32x72xf32>
    %22 = arith.maximumf %20, %21 : vector<32x72xf32>
    %c176 = arith.constant 176 : index
    %c0_10 = arith.constant 0 : index
    %23 = vector.load %arg1[%c176, %c0_10] : memref<320x72xf32, #tpu.memory_space<vmem>>, vector<72x72xf32>
    %cst_11 = arith.constant dense<0.000000e+00> : vector<32x72xf32>
    %24 = tpu.matmul %22, %23, %cst_11 {dimension_numbers = #tpu.dot_dimension_numbers<[1], [0], [0], [1], [0, 0, 1, 1], [], []>} : vector<32x72xf32>, vector<72x72xf32>, vector<32x72xf32> -> vector<32x72xf32>
    %25 = arith.addf %18, %24 : vector<32x72xf32>
    %c248 = arith.constant 248 : index
    %c0_12 = arith.constant 0 : index
    %26 = vector.load %arg1[%c248, %c0_12] : memref<320x72xf32, #tpu.memory_space<vmem>>, vector<72x72xf32>
    %cst_13 = arith.constant dense<0.000000e+00> : vector<32x72xf32>
    %27 = tpu.matmul %25, %26, %cst_13 {dimension_numbers = #tpu.dot_dimension_numbers<[1], [0], [0], [1], [0, 0, 1, 1], [], []>} : vector<32x72xf32>, vector<72x72xf32>, vector<32x72xf32> -> vector<32x72xf32>
    %cst_14 = arith.constant 0.000000e+00 : f32
    %28 = vector.broadcast %cst_14 : f32 to vector<32x72xf32>
    %29 = arith.maximumf %27, %28 : vector<32x72xf32>
    %30 = tpu.concatenate %25, %29 in 1 : vector<32x72xf32>, vector<32x72xf32> -> vector<32x144xf32>
    %c0_15 = arith.constant 0 : index
    %c0_16 = arith.constant 0 : index
    %31 = vector.load %arg2[%c0_15, %c0_16] : memref<144x128xf32, #tpu.memory_space<vmem>>, vector<144x128xf32>
    %cst_17 = arith.constant dense<0.000000e+00> : vector<32x128xf32>
    %32 = tpu.matmul %30, %31, %cst_17 {dimension_numbers = #tpu.dot_dimension_numbers<[1], [0], [0], [1], [0, 0, 1, 1], [], []>} : vector<32x144xf32>, vector<144x128xf32>, vector<32x128xf32> -> vector<32x128xf32>
    %c0_18 = arith.constant 0 : index
    %c0_19 = arith.constant 0 : index
    %33 = vector.load %arg3[%c0_18, %c0_19] : memref<32x128xf32, #tpu.memory_space<vmem>>, vector<32x128xf32>
    tpu.vector_store %arg3[%c0_18, %c0_19], %32 {strides = array<i32>} : memref<32x128xf32, #tpu.memory_space<vmem>>, vector<32x128xf32>,
    return
  }
}

</mosaic_0001>

<bundles_post_ra>
// kernel: basic_model_forward.1
= control target key start
LH: loop header
LB: loop body
LE: loop exit
PB: predicated region body
PF: predicated region fallthrough
CT: control target
= control target key end

     0   :  { %v18_v0 = vlaneseq  ;;  %s947_s27 = smov 48   ;;  %s948_s28 = smov 24   ;;  %vm93_vm6 = vcmask 195584   ;;  %vm98_vm7 = vcmask 392192   ;;  %vm116_vm8 = vcmask 588800   ;;  %s1251_s0 = inlined_call_operand.vmem [shape: f32[32,24], index: 0, kind: input, shape index: {}]   ;;  %s1252_s1 = inlined_call_operand.vmem [shape: f32[320,72], index: 1, kind: input, shape index: {}]   ;;  %s1253_s2 = inlined_call_operand.vmem [shape: f32[144,128], index: 2, kind: input, shape index: {}]   ;;  %s1254_s3 = inlined_call_operand.vmem [shape: f32[32,128], index: 3, kind: output, shape index: {}]  }
   0x1   :  { %v974_v1 = vld [vmem:[%s1251_s0] sm:$0xff]  ;;  %v979_v2 = vld [vmem:[%s1251_s0 + $0x8] sm:$0xff]  ;;  %v984_v3 = vld [vmem:[%s1251_s0 + $0x18] sm:$0xff]  ;;  %s950_s23 = smov 72   ;;  %vm582_vm9 = vcmask 130048  }
   0x2   :  { %v19_v4 = vshrl.u32 %v18_v0, 7  ;;  %v48_v5 = vrot.slane %v974_v1, 1  ;;  %v49_v6 = vrot.slane %v979_v2, 1  ;;  %v31_v7 = vrot.slane %v974_v1, 7  ;;  %v992_v8 = vld [vmem:[%s1251_s0 + $0x10] sm:$0xff]  ;;  %v103_v13 = vld [vmem:[%s1252_s1] sm:$0xff] }
   0x3   :  { %v34_v9 = vrot.slane %v984_v3, 7  ;;  %v50_v10 = vrot.slane %v992_v8, 1  ;;  %v32_v16 = vrot.slane %v979_v2, 7  ;;  %v33_v17 = vrot.slane %v992_v8, 7  ;;  %v104_v18 = vld [vmem:[%s1252_s1 + $0x8] sm:$0xff]  ;;  %v105_v19 = vld [vmem:[%s1252_s1 + $0x10] sm:$0xff] }
   0x4   :  { %vm52_vm0 = vcmp.lt.s32.totalorder %v19_v4, 7  ;;  %v23_v11 = vand.u32 15, %v19_v4  ;;  %vm35_vm1 = vcmp.lt.s32.totalorder %v19_v4, 1  ;;  %v20_v12 = vadd.s32 8, %v19_v4  ;;  %v106_v20 = vld [vmem:[%s1252_s1 + $0x18] sm:$0xff]  ;;  %v107_v33 = vld [vmem:[%s1252_s1 + $0x20] sm:$0xff] }
   0x5   :  { %v55_v14 = vsel %vm52_vm0, %v48_v5, %v49_v6  ;;  %v39_v15 = vsel %vm35_vm1, %v34_v9, %v31_v7  ;;  %v54_v22 = vsel %vm52_vm0, %v49_v6, %v50_v10  ;;  %v21_v23 = vadd.s32 16, %v19_v4  ;;  %v108_v34 = vld [vmem:[%s1252_s1 + $0x28] sm:$0xff]  ;;  %v109_v41 = vld [vmem:[%s1252_s1 + $0x30] sm:$0xff]  ;;  %v110_v42 = vld [vmem:[%s1252_s1 + $0x38] sm:$0xff] }
   0x6   :  { %81 = vrot.lane.b32.xlu1 %v55_v14, %s947_s27  ;;  %vm27_vm2 = vcmp.gt.s32.totalorder %v23_v11, 0  ;;  %v24_v21 = vand.u32 15, %v20_v12  ;;  %v22_v25 = vadd.s32 24, %v19_v4  ;;  %v51_v26 = vrot.slane %v984_v3, 1  ;;  %v111_v46 = vld [vmem:[%s1252_s1 + $0x40] sm:$0xff]  ;;  %v214_v47 = vld [vmem:[%s1252_s1 + $0x68] sm:$0xff] }
   0x7   :  { %v40_v24 = vsel %vm27_vm2, %v39_v15, 0.0  ;;  %v25_v27 = vand.u32 15, %v21_v23  ;;  %v852_v28 = vpack.c.bf16 %v104_v18, %v103_v13  ;;  %v856_v29 = vpack.c.bf16 %v106_v20, %v105_v19  ;;  %v215_v48 = vld [vmem:[%s1252_s1 + $0x70] sm:$0xff]  ;;  %v216_v55 = vld [vmem:[%s1252_s1 + $0x78] sm:$0xff]  ;;  %v217_v56 = vld [vmem:[%s1252_s1 + $0x80] sm:$0xff] }
   0x8   :  { %65 = vrot.lane.b32.xlu0 %v40_v24, %s948_s28  ;;  %vm45_vm3 = vcmp.lt.s32.totalorder %v24_v21, 15  ;;  %v38_v31 = vsel %vm35_vm1, %v31_v7, %v32_v16  ;;  %v26_v32 = vand.u32 15, %v22_v25  ;;  %v37_v36 = vsel %vm35_vm1, %v32_v16, %v33_v17  ;;  %v218_v62 = vld [vmem:[%s1252_s1 + $0x88] sm:$0xff]  ;;  %v219_v63 = vld [vmem:[%s1252_s1 + $0x90] sm:$0xff]  ;;  %v221_v4 = vld [vmem:[%s1252_s1 + $0xa0] sm:$0xff] }
   0x9   :  { %v58_v30 = vsel %vm45_vm3, %v54_v22, 0.0  ;;  %vm1023_vm4 = vcmp.gt.s32.totalorder %v25_v27, 0  ;;  %853 = vmatprep.subr.bf16.mxu1 %v852_v28  ;;  %v36_v37 = vsel %vm35_vm1, %v33_v17, %v34_v9  ;;  %v56_v38 = vsel %vm52_vm0, %v51_v26, %v48_v5  ;;  %v325_v13 = vld [vmem:[%s1252_s1 + $0xb8] sm:$0xff]  ;;  %v326_v14 = vld [vmem:[%s1252_s1 + $0xc0] sm:$0xff]  ;;  %v327_v16 = vld [vmem:[%s1252_s1 + $0xc8] sm:$0xff] }
   0xa   :  { %83 = vrot.lane.b32.xlu1 %v58_v30, %s947_s27  ;;  %855 = vmatpush3.bf16.msra.mxu1 %v852_v28  ;;  %vm47_vm5 = vcmp.lt.s32.totalorder %v26_v32, 15  ;;  %v860_v39 = vpack.c.bf16 %v108_v34, %v107_v33  ;;  %v42_v40 = vsel %vm1023_vm4, %v37_v36, 0.0  ;;  %v864_v44 = vpack.c.bf16 %v110_v42, %v109_v41  ;;  %v328_v18 = vld [vmem:[%s1252_s1 + $0xd0] sm:$0xff]  ;;  %v329_v19 = vld [vmem:[%s1252_s1 + $0xd8] sm:$0xff]  ;;  %v330_v21 = vld [vmem:[%s1252_s1 + $0xe0] sm:$0xff] }
   0xb   :  { %857 = vmatprep.subr.bf16.mxu1 %v856_v29  ;;  %v60_v43 = vsel %vm47_vm5, %v56_v38, 0.0  ;;  %v53_v45 = vsel %vm52_vm0, %v50_v10, %v51_v26  ;;  %v868_v49 = vpack.c.bf16 %v215_v48, %v214_v47  ;;  %v872_v59 = vpack.c.bf16 %v217_v56, %v216_v55  ;;  %v331_v22 = vld [vmem:[%s1252_s1 + $0xe8] sm:$0xff]  ;;  %v113_v25 = vld [vmem:[%s1252_s1 + $0x50] sm:$0xff]  ;;  %v114_v30 = vld [vmem:[%s1252_s1 + $0x58] sm:$0xff] }
   0xc   :  { %67 = vrot.lane.b32.xlu0 %v38_v31, %s948_s28  ;;  %v888_v17 = vpack.c.bf16 %v327_v16, %v326_v14  ;;  %v892_v20 = vpack.c.bf16 %v329_v19, %v328_v18  ;;  %v896_v23 = vpack.c.bf16 %v331_v22, %v330_v21  ;;  %v112_v24 = vld [vmem:[%s1252_s1 + $0x48] sm:$0xff]  ;;  %v115_v31 = vld [vmem:[%s1252_s1 + $0x60] sm:$0xff]  ;;  %v332_v36 = vld [vmem:[%s1252_s1 + $0xf0] sm:$0xff] }
   0xd   :  { %v435_v38 = vld [vmem:[%s1252_s1 + $0x100] sm:$0xff]  ;;  %v437_v41 = vld [vmem:[%s1252_s1 + $0x110] sm:$0xff]  ;;  %v573_v16 = vld [vmem:[%s1253_s2 + $0x48] sm:$0xff] }
   0xe   :  { %71 = vrot.lane.b32.xlu1 %v36_v37, %s948_s28  ;;  %859 = vmatpush3.bf16.msra.mxu1 %v856_v29  ;;  %v434_v37 = vld [vmem:[%s1252_s1 + $0xf8] sm:$0xff]  ;;  %v441_v47 = vld [vmem:[%s1252_s1 + $0x130] sm:$0xff]  ;;  %v576_v21 = vld [vmem:[%s1253_s2 + $0x60] sm:$0xff] }
   0xf   :  { %861 = vmatprep.subr.bf16.mxu1 %v860_v39  ;;  %v574_v18 = vld [vmem:[%s1253_s2 + $0x50] sm:$0xff]  ;;  %v575_v19 = vld [vmem:[%s1253_s2 + $0x58] sm:$0xff]  ;;  %v577_v22 = vld [vmem:[%s1253_s2 + $0x68] sm:$0xff] }
  0x10   :  { %69 = vrot.lane.b32.xlu0 %v42_v40, %s948_s28  ;;  %v900_v40 = vpack.c.bf16 %v435_v38, %v434_v37 }
  0x12   :  { %87 = vrot.lane.b32.xlu1 %v60_v43, %s947_s27  ;;  %863 = vmatpush3.bf16.msra.mxu1 %v860_v39  ;;  %v436_v39 = vld [vmem:[%s1252_s1 + $0x108] sm:$0xff]  ;;  %v438_v43 = vld [vmem:[%s1252_s1 + $0x118] sm:$0xff] }
  0x13   :  { %865 = vmatprep.subr.bf16.mxu1 %v864_v44  ;;  %v904_v42 = vpack.c.bf16 %v437_v41, %v436_v39 }
  0x14   :  { %85 = vrot.lane.b32.xlu0 %v53_v45, %s947_s27 }
  0x16   :  { %867 = vmatpush3.bf16.msra.mxu1 %v864_v44  ;;  %v439_v44 = vld [vmem:[%s1252_s1 + $0x120] sm:$0xff] }
  0x17   :  { %772 = vmatprep.subr.mxu1 %v111_v46  ;;  %v908_v45 = vpack.c.bf16 %v439_v44, %v438_v43 }
  0x1a   :  { %773 = vmatpush3.msra.mxu1 %v111_v46  ;;  %v440_v46 = vld [vmem:[%s1252_s1 + $0x128] sm:$0xff] }
  0x1b   :  { %869 = vmatprep.subr.bf16.mxu1 %v868_v49  ;;  %v912_v48 = vpack.c.bf16 %v441_v47, %v440_v46 }
  0x78   :  { %v82_v50 = vpop.permute.xlu1 %81 }
  0x7a   :  { %v66_v51 = vpop.permute.xlu0 %65 }
  0x7b   :  { %v94_v52 = vsel %vm93_vm6, %v974_v1, %v66_v51  ;;  %v876_v1 = vpack.c.bf16 %v219_v63, %v218_v62 }
  0x7c   :  { %v84_v53 = vpop.permute.xlu1 %83  ;;  %v99_v54 = vsel %vm98_vm7, %v94_v52, %v82_v50 }
  0x7d   :  { %774 = vmatprep.mubr.msk.f32.mxu1 %vm116_vm8, %v99_v54 }
  0x7e   :  { %v68_v57 = vpop.permute.xlu0 %67 }
  0x7f   :  { %v95_v58 = vsel %vm93_vm6, %v979_v2, %v68_v57  ;;  %v220_v2 = vld [vmem:[%s1252_s1 + $0x98] sm:$0xff] }
  0x80   :  { %v72_v60 = vpop.permute.xlu1 %71  ;;  %v100_v61 = vsel %vm98_vm7, %v95_v58, %v84_v53  ;;  %v880_v11 = vpack.c.bf16 %v221_v4, %v220_v2  ;;  %v442_v57 = vld [vmem:[%s1252_s1 + $0x138] sm:$0xff]  ;;  %v949_v2 = vmov 0.0|0.0   ;;  %v564_v4 = vld [vmem:[%s1253_s2] sm:$0xff] }
  0x81   :  { %775 = vmatmul.mubr.msk.f32.vlgmr.msra.gmra.mrb[0].mxu1 %vm116_vm8, %v100_v61  ;;  %v97_v5 = vsel %vm93_vm6, %v984_v3, %v72_v60  ;;  %v222_v3 = vld [vmem:[%s1252_s1 + $0xa8] sm:$0xff] }
  0x82   :  { %v70_v0 = vpop.permute.xlu0 %69  ;;  %871 = vmatpush3.bf16.msra.mxu1 %v868_v49 }
  0x83   :  { %873 = vmatprep.subr.bf16.mxu1 %v872_v59  ;;  %v96_v7 = vsel %vm93_vm6, %v992_v8, %v70_v0  ;;  %v324_v8 = vld [vmem:[%s1252_s1 + $0xb0] sm:$0xff] }
  0x84   :  { %v88_v6 = vpop.permute.xlu1 %87  ;;  %v884_v15 = vpack.c.bf16 %v325_v13, %v324_v8  ;;  %v570_v8 = vld [vmem:[%s1253_s2 + $0x30] sm:$0xff]  ;;  %v571_v13 = vld [vmem:[%s1253_s2 + $0x38] sm:$0xff] }
  0x85   :  { %v102_v12 = vsel %vm98_vm7, %v97_v5, %v88_v6  ;;  %v565_v5 = vld [vmem:[%s1253_s2 + $0x8] sm:$0xff]  ;;  %v566_v6 = vld [vmem:[%s1253_s2 + $0x10] sm:$0xff]  ;;  %v926_v14 = vpack.c.bf16 %v571_v13, %v570_v8 }
  0x86   :  { %v86_v9 = vpop.permute.xlu0 %85  ;;  %875 = vmatpush3.bf16.msra.mxu1 %v872_v59  ;;  %885 = vmatprep.subr.bf16.mxu0 %v884_v15 }
  0x87   :  { %v101_v10 = vsel %vm98_vm7, %v96_v7, %v86_v9  ;;  %877 = vmatprep.subr.bf16.mxu1 %v876_v1  ;;  %887 = vmatpush3.bf16.msra.mxu0 %v884_v15  ;;  %v917_v7 = vpack.c.bf16 %v565_v5, %v564_v4  ;;  %v567_v9 = vld [vmem:[%s1253_s2 + $0x18] sm:$0xff]  ;;  %v572_v15 = vld [vmem:[%s1253_s2 + $0x40] sm:$0xff] }
  0x88   :  { %777 = vmatprep.mubr.msk.f32.mxu1 %vm116_vm8, %v101_v10  ;;  %889 = vmatprep.subr.bf16.mxu0 %v888_v17  ;;  %v920_v10 = vpack.c.bf16 %v567_v9, %v566_v6 }
  0x89   :  { %778 = vmatmul.mubr.msk.f32.gmra.mrb[2].mxu1 %vm116_vm8, %v102_v12  ;;  %v569_v12 = vld [vmem:[%s1253_s2 + $0x28] sm:$0xff] }
  0x8a   :  { %879 = vmatpush3.bf16.msra.mxu1 %v876_v1 }
  0x8b   :  { %881 = vmatprep.subr.bf16.mxu1 %v880_v11  ;;  %891 = vmatpush3.bf16.msra.mxu0 %v888_v17  ;;  %v929_v17 = vpack.c.bf16 %v573_v16, %v572_v15 }
  0x8c   :  { %893 = vmatprep.subr.bf16.mxu0 %v892_v20 }
  0x8e   :  { %883 = vmatpush3.bf16.msra.mxu1 %v880_v11  ;;  %v568_v11 = vld [vmem:[%s1253_s2 + $0x20] sm:$0xff] }
  0x8f   :  { %796 = vmatprep.subr.mxu1 %v222_v3  ;;  %895 = vmatpush3.bf16.msra.mxu0 %v892_v20  ;;  %v932_v20 = vpack.c.bf16 %v575_v19, %v574_v18 }
  0x90   :  { %897 = vmatprep.subr.bf16.mxu0 %v896_v23 }
  0x92   :  { %797 = vmatpush3.msra.mxu1 %v222_v3  ;;  %v923_v3 = vpack.c.bf16 %v569_v12, %v568_v11 }
  0x93   :  { %899 = vmatpush3.bf16.msra.mxu0 %v896_v23  ;;  %901 = vmatprep.subr.bf16.mxu1 %v900_v40  ;;  %v935_v23 = vpack.c.bf16 %v577_v22, %v576_v21 }
  0x94   :  { %820 = vmatprep.subr.mxu0 %v332_v36 }
  0x97   :  { %821 = vmatpush3.msra.mxu0 %v332_v36 }
  0x98   :  { %916 = vmatprep.subr.bf16.mxu0 %v949_v2 }
 0x154   :  { %v776_v26 = vpop.f32.mrb[0].mxu1 }
 0x155   :  { %v195_v27 = vpop.f32.mrb[1].mxu1  ;;  %v201_v29 = vadd.f32 %v776_v26, %v113_v25  ;;  %v579_v25 = vld [vmem:[%s1253_s2 + $0x78] sm:$0xff] }
 0x156   :  { %v196_v28 = vadd.f32 %v195_v27, %v112_v24  ;;  %v578_v24 = vld [vmem:[%s1253_s2 + $0x70] sm:$0xff]  ;;  %v580_v27 = vld [vmem:[%s1253_s2 + $0x80] sm:$0xff] }
 0x157   :  { %v938_v26 = vpack.c.bf16 %v579_v25, %v578_v24 }
 0x158   :  { %798 = vmatprep.mubr.msk.f32.mxu1 %vm116_vm8, %v196_v28 }
 0x159   :  { %799 = vmatmul.mubr.msk.f32.vlgmr.msra.gmra.mrb[4].mxu1 %vm116_vm8, %v201_v29 }
 0x15a   :  { %903 = vmatpush3.bf16.msra.mxu1 %v900_v40 }
 0x15b   :  { %905 = vmatprep.subr.bf16.mxu1 %v904_v42 }
 0x15c   :  { %v779_v32 = vpop.f32.mrb[2].mxu1 }
 0x15d   :  { %v205_v33 = vpop.f32.mrb[3].mxu1  ;;  %v211_v35 = vadd.f32 %v779_v32, %v115_v31 }
 0x15e   :  { %v206_v34 = vadd.f32 %v205_v33, %v114_v30  ;;  %907 = vmatpush3.bf16.msra.mxu1 %v904_v42 }
 0x15f   :  { %909 = vmatprep.subr.bf16.mxu1 %v908_v45 }
 0x160   :  { %801 = vmatprep.mubr.msk.f32.mxu1 %vm116_vm8, %v206_v34 }
 0x161   :  { %802 = vmatmul.mubr.msk.f32.gmra.mrb[6].mxu1 %vm116_vm8, %v211_v35 }
 0x162   :  { %911 = vmatpush3.bf16.msra.mxu1 %v908_v45 }
 0x163   :  { %913 = vmatprep.subr.bf16.mxu1 %v912_v48 }
 0x166   :  { %915 = vmatpush3.bf16.msra.mxu1 %v912_v48 }
 0x167   :  { %844 = vmatprep.subr.mxu1 %v442_v57 }
 0x16a   :  { %845 = vmatpush3.msra.mxu1 %v442_v57 }
 0x22c   :  { %v800_v49 = vpop.f32.mrb[4].mxu1 }
 0x22d   :  { %v301_v50 = vpop.f32.mrb[5].mxu1  ;;  %v321_v52 = vmax.f32 %v800_v49, 0.0 }
 0x22e   :  { %v320_v51 = vmax.f32 %v301_v50, 0.0 }
 0x230   :  { %822 = vmatprep.mubr.msk.f32.mxu0 %vm116_vm8, %v320_v51 }
 0x231   :  { %823 = vmatmul.mubr.msk.f32.vlgmr.msra.gmra.mrb[0].mxu0 %vm116_vm8, %v321_v52 }
 0x232   :  { %918 = vmatpush1.bf16.msra.mxu0 %v917_v7 }
 0x233   :  { %919 = vmatprep.subr.bf16.mxu0 %v949_v2 }
 0x234   :  { %v803_v53 = vpop.f32.mrb[6].mxu1 }
 0x235   :  { %v311_v54 = vpop.f32.mrb[7].mxu1  ;;  %v323_v56 = vmax.f32 %v803_v53, 0.0 }
 0x236   :  { %v322_v55 = vmax.f32 %v311_v54, 0.0  ;;  %921 = vmatpush1.bf16.msra.mxu0 %v920_v10 }
 0x237   :  { %922 = vmatprep.subr.bf16.mxu0 %v949_v2 }
 0x238   :  { %825 = vmatprep.mubr.msk.f32.mxu0 %vm116_vm8, %v322_v55 }
 0x239   :  { %826 = vmatmul.mubr.msk.f32.gmra.mrb[2].mxu0 %vm116_vm8, %v323_v56 }
 0x23a   :  { %924 = vmatpush1.bf16.msra.mxu0 %v923_v3 }
 0x23b   :  { %925 = vmatprep.subr.bf16.mxu0 %v949_v2 }
 0x23e   :  { %927 = vmatpush1.bf16.msra.mxu0 %v926_v14 }
 0x23f   :  { %928 = vmatprep.subr.bf16.mxu0 %v949_v2 }
 0x242   :  { %930 = vmatpush1.bf16.msra.mxu0 %v929_v17 }
 0x243   :  { %931 = vmatprep.subr.bf16.mxu0 %v949_v2 }
 0x246   :  { %933 = vmatpush1.bf16.msra.mxu0 %v932_v20 }
 0x247   :  { %934 = vmatprep.subr.bf16.mxu0 %v949_v2 }
 0x24a   :  { %936 = vmatpush1.bf16.msra.mxu0 %v935_v23 }
 0x24b   :  { %937 = vmatprep.subr.bf16.mxu0 %v949_v2 }
 0x24e   :  { %939 = vmatpush1.bf16.msra.mxu0 %v938_v26 }
 0x24f   :  { %940 = vmatprep.subr.bf16.mxu0 %v949_v2 }
 0x304   :  { %v824_v58 = vpop.f32.mrb[0].mxu0 }
 0x305   :  { %v411_v59 = vpop.f32.mrb[1].mxu0  ;;  %v1163_v61 = vadd.f32 %v824_v58, %v201_v29 }
 0x306   :  { %v1161_v60 = vadd.f32 %v411_v59, %v196_v28  ;;  %v581_v28 = vld [vmem:[%s1253_s2 + $0x88] sm:$0xff] }
 0x307   :  { %v941_v29 = vpack.c.bf16 %v581_v28, %v580_v27 }
 0x308   :  { %846 = vmatprep.mubr.msk.f32.mxu1 %vm116_vm8, %v1161_v60 }
 0x309   :  { %847 = vmatmul.mubr.msk.f32.vlgmr.msra.gmra.mrb[8].mxu1 %vm116_vm8, %v1163_v61  ;;  %942 = vmatpush1.bf16.msra.mxu0 %v941_v29 }
 0x30c   :  { %v827_v62 = vpop.f32.mrb[2].mxu0 }
 0x30d   :  { %v421_v63 = vpop.f32.mrb[3].mxu0  ;;  %v1171_v1 = vadd.f32 %v827_v62, %v211_v35 }
 0x30e   :  { %v1169_v0 = vadd.f32 %v421_v63, %v206_v34 }
 0x310   :  { %849 = vmatprep.mubr.msk.f32.mxu1 %vm116_vm8, %v1169_v0 }
 0x311   :  { %850 = vmatmul.mubr.msk.f32.gmra.mrb[10].mxu1 %vm116_vm8, %v1171_v1 }
 0x3dc   :  { %v848_v30 = vpop.f32.mrb[8].mxu1 }
 0x3dd   :  { %v541_v31 = vmax.f32 %v848_v30, 0.0  ;;  %v521_v32 = vpop.f32.mrb[9].mxu1 }
 0x3de   :  { %v540_v33 = vmax.f32 %v521_v32, 0.0 }
 0x3df   :  { %550 = vrot.lane.b32.xlu1 %v541_v31, %s950_s23 }
 0x3e0   :  { %548 = vrot.lane.b32.xlu0 %v540_v33, %s950_s23 }
 0x3e4   :  { %v851_v34 = vpop.f32.mrb[10].mxu1 }
 0x3e5   :  { %v543_v35 = vmax.f32 %v851_v34, 0.0  ;;  %v531_v36 = vpop.f32.mrb[11].mxu1 }
 0x3e6   :  { %v542_v37 = vmax.f32 %v531_v36, 0.0 }
 0x3e7   :  { %554 = vrot.lane.b32.xlu1 %v543_v35, %s950_s23 }
 0x3e8   :  { %552 = vrot.lane.b32.xlu0 %v542_v37, %s950_s23 }
 0x451   :  { %v551_v40 = vpop.permute.xlu1 %550 }
 0x452   :  { %v549_v38 = vpop.permute.xlu0 %548  ;;  %v561_v41 = vsel %vm116_vm8, %v1163_v61, %v551_v40 }
 0x453   :  { %v560_v39 = vsel %vm116_vm8, %v1161_v60, %v549_v38  ;;  %700 = vmatprep.mubr.msk.f32.mxu0 %vm582_vm9, %v549_v38 }
 0x454   :  { %656 = vmatmul.mubr.f32.vlgmr.msra.gmra.mrb[4].mxu0 %v560_v39 }
 0x455   :  { %701 = vmatprep.mubr.msk.f32.mxu0 %vm582_vm9, %v551_v40 }
 0x458   :  { %661 = vmatmul.mubr.f32.gmra.mrb[6].mxu0 %v561_v41 }
 0x459   :  { %v555_v44 = vpop.permute.xlu1 %554 }
 0x45a   :  { %v553_v42 = vpop.permute.xlu0 %552  ;;  %v563_v45 = vsel %vm116_vm8, %v1171_v1, %v555_v44 }
 0x45b   :  { %702 = vmatprep.mubr.msk.f32.mxu0 %vm582_vm9, %v553_v42  ;;  %v562_v43 = vsel %vm116_vm8, %v1169_v0, %v553_v42 }
 0x45c   :  { %666 = vmatmul.mubr.f32.gmra.mrb[8].mxu0 %v562_v43 }
 0x45d   :  { %703 = vmatprep.mubr.msk.f32.mxu0 %vm582_vm9, %v555_v44 }
 0x460   :  { %671 = vmatmul.mubr.f32.gmra.mrb[10].mxu0 %v563_v45 }
 0x527   :  { %v657_v46 = vpop.f32.mrb[4].mxu0 }
 0x528   :  { %676 = vst [vmem:[%s1254_s3] sm:$0xff] %v657_v46  ;;  %v659_v47 = vpop.f32.mrb[5].mxu0 }
 0x52b   :  { %v662_v48 = vpop.f32.mrb[6].mxu0 }
 0x52c   :  { %677 = vst [vmem:[%s1254_s3 + $0x8] sm:$0xff] %v662_v48  ;;  %v664_v49 = vpop.f32.mrb[7].mxu0 }
 0x52f   :  { %v667_v50 = vpop.f32.mrb[8].mxu0 }
 0x530   :  { %678 = vst [vmem:[%s1254_s3 + $0x10] sm:$0xff] %v667_v50  ;;  %v669_v51 = vpop.f32.mrb[9].mxu0 }
 0x533   :  { %v672_v52 = vpop.f32.mrb[10].mxu0 }
 0x534   :  { %679 = vst [vmem:[%s1254_s3 + $0x18] sm:$0xff] %v672_v52  ;;  %v674_v53 = vpop.f32.mrb[11].mxu0 }

</bundles_post_ra>
